<compile_context>
chip_gen: v6e
topology: v6e:2x2x1
jax: 0.10.0
libtpu: 0.0.40
codegen_flags: <defaults>
</compile_context>

<pallas_src>
import functools
from collections import defaultdict

import numpy as np
import jax
import jax.numpy as jnp
from jax import lax
from jax.experimental import pallas as pl
from jax.experimental.pallas import tpu as pltpu


# ----------------------------------------------------------------------------
# Fused panoptic kernel
# ----------------------------------------------------------------------------
def _panoptic_kernel(logits_ref, t_ref, wh_ref,
                     mid_ref, scores_ref, labels_ref, keep_ref,
                     best_ref, bid_ref,
                     *, threshold, num_chunks):
    i = pl.program_id(1)                       # row-tile index ("arbitrary")
    c = pl.program_id(2)                       # query-chunk index (innermost)
    C, QPAD = logits_ref.shape[1], logits_ref.shape[2]
    TILE_H, Hm = wh_ref.shape
    Wp = mid_ref.shape[2]
    QC = t_ref.shape[2] // Wp

    # ---------------- per-image prologue (first grid step only) ----------------
    @pl.when(jnp.logical_and(i == 0, c == 0))
    def _prologue():
        lg = logits_ref[0]                                        # (C, QPAD) f32
        mx = jnp.max(lg, axis=0, keepdims=True)                   # (1, QPAD)
        denom = jnp.sum(jnp.exp(lg - mx), axis=0, keepdims=True)  # (1, QPAD)
        scores = 1.0 / denom                                      # max softmax prob
        cidx = lax.broadcasted_iota(jnp.int32, (C, QPAD), 0)
        labels = jnp.min(jnp.where(lg >= mx, cidx, jnp.int32(2 ** 30)),
                         axis=0, keepdims=True)                   # first-occurrence argmax
        keep = jnp.logical_and(labels != (C - 1), scores > threshold)
        scores_ref[0] = scores                                    # lane-dense stores
        labels_ref[0] = labels
        keep_ref[0] = keep.astype(jnp.int32)

    # ---------------- hot loop: one wide MXU matmul per (row tile, chunk) -------
    # t_ref holds the W-upsampled, keep-masked (-1e30 for dropped/padded queries)
    # bf16 masks for this query chunk; wh rows are non-negative and sum to 1, so
    # dropped queries stay ~-1e30 after the matmul and never win the argmax.
    up = jnp.dot(wh_ref[...], t_ref[0],
                 preferred_element_type=jnp.float32)              # (TILE_H, QC*Wp) f32

    # per-pixel running argmax over this chunk's QC query column groups.
    # TODO(synk): switch to lax.fori_loop(..., unroll=4-8) slicing `up` per group
    # for production QC (>~32); neutral at demo QC=8.
    best = up[:, 0:Wp]
    bid = jnp.zeros((TILE_H, Wp), jnp.int32)
    for q in range(1, QC):
        cand = up[:, q * Wp:(q + 1) * Wp]
        better = cand > best                                      # strict -> first index wins ties
        best = jnp.where(better, cand, best)
        bid = jnp.where(better, q, bid)

    if num_chunks == 1:
        # single chunk (demo / small Q): store the id map directly, no scratch.
        mid_ref[0] = bid
    else:
        @pl.when(c == 0)
        def _init():
            best_ref[...] = best
            bid_ref[...] = bid

        @pl.when(c > 0)
        def _merge():
            better = best > best_ref[...]                         # earlier chunks win ties
            bid_ref[...] = jnp.where(better, bid + c * QC, bid_ref[...])
            best_ref[...] = jnp.where(better, best, best_ref[...])

        @pl.when(c == num_chunks - 1)
        def _write():
            mid_ref[0] = bid_ref[...]                             # lane-dense (TILE_H, Wp) store


def _choose_tiles(Hout, Q, Hm, Wp):
    """Pick (TILE_H, QC, Qp).

    QC: largest query chunk whose double-buffered (1, Hm, QC*Wp) bf16 input block
        stays <= 6 MiB (budget chosen to also hold on v7x's 64 MiB VMEM).
    TILE_H: LARGEST divisor of Hout whose f32 matmul result + argmax scratch fits
        ~10 MiB (per-grid-step overhead ~0.35us dominates tiny tiles).
    """
    qc = max(1, Q)
    while qc > 1 and 2 * Hm * qc * Wp * 2 > 6 * 1024 * 1024:
        qc = (qc + 1) // 2
    qp = ((Q + qc - 1) // qc) * qc

    cands = [Hout] + [t for t in (1024, 512, 256, 128, 64, 32, 16, 8)
                      if t < Hout and Hout % t == 0]
    tile_h = cands[-1]
    for t in cands:
        if t * qc * Wp * 4 + 2 * t * Wp * 8 <= 10 * 1024 * 1024:
            tile_h = t
            break
    return tile_h, qc, qp


def panoptic_device(pred_logits, pred_masks, processed_size, threshold):
    """One pallas_call for the whole batch.

    pred_logits: (B, Q, C) f32, pred_masks: (B, Q, Hm, Wm) f32.
    Returns (m_id (B,H,W) i32, scores (B,1,QPAD) f32, labels (B,1,QPAD) i32,
             keep (B,1,QPAD) i32).
    """
    B, Q, C = pred_logits.shape
    Hm, Wm = pred_masks.shape[2], pred_masks.shape[3]
    Hout, Wout = int(processed_size[0]), int(processed_size[1])
    QPAD = max(128, ((Q + 127) // 128) * 128)
    Wp = ((Wout + 127) // 128) * 128            # lane-dense output width (cropped after)

    TILE_H, QC, Qp = _choose_tiles(Hout, Q, Hm, Wp)
    n_h = Hout // TILE_H
    n_qc = Qp // QC

    # ---- host-side layout plumbing (cheap XLA ops, once per batch) -------------
    # logits transposed to (B, C, QPAD) so class reductions become lane rows.
    logits_t = jnp.transpose(pred_logits, (0, 2, 1))
    logits_t = jnp.pad(logits_t, ((0, 0), (0, 0), (0, QPAD - Q)))

    # keep mask (same formula as the in-kernel prologue); only used to bake the
    # -1e30 argmax sentinel into the pre-upsampled masks.
    mx = jnp.max(pred_logits, axis=-1, keepdims=True)
    scores_x = 1.0 / jnp.sum(jnp.exp(pred_logits - mx), axis=-1)       # (B, Q)
    labels_x = jnp.argmax(pred_logits, axis=-1)                        # (B, Q)
    keep_x = jnp.logical_and(labels_x != (C - 1), scores_x > threshold)

    # W-direction bilinear upsample of every query mask as ONE einsum, keep-masked
    # with -1e30, padded to (Qp, Wp), cast to bf16, laid out lane-dense.
    wwt = jnp.asarray(bilinear_matrix(Wout, Wm).T, dtype=jnp.float32)  # (Wm, Wout)
    t = jnp.einsum('bqhw,wx->bhqx', pred_masks, wwt)                   # (B, Hm, Q, Wout)
    t = jnp.where(keep_x[:, None, :, None], t, -1e30)
    t = jnp.pad(t, ((0, 0), (0, 0), (0, Qp - Q), (0, Wp - Wout)),
                constant_values=-1e30)
    t = t.reshape(B, Hm, Qp * Wp).astype(jnp.bfloat16)                 # lane-dense bf16

    wh = jnp.asarray(bilinear_matrix(Hout, Hm), dtype=jnp.bfloat16)    # (Hout, Hm) bf16

    kern = functools.partial(_panoptic_kernel, threshold=float(threshold),
                             num_chunks=n_qc)
    # TODO(synk): for B == 1 on v7x, make a Wout-column-tile axis the "parallel"
    # dimension instead of the batch axis to use both TensorCores.
    m_id, scores, labels, keep = pl.pallas_call(
        kern,
        grid=(B, n_h, n_qc),
        in_specs=[
            pl.BlockSpec((1, C, QPAD), lambda b, i, c: (b, 0, 0)),
            pl.BlockSpec((1, Hm, QC * Wp), lambda b, i, c: (b, 0, c)),
            pl.BlockSpec((TILE_H, Hm), lambda b, i, c: (i, 0)),
        ],
        out_specs=(
            pl.BlockSpec((1, TILE_H, Wp), lambda b, i, c: (b, i, 0)),  # m_id
            pl.BlockSpec((1, 1, QPAD), lambda b, i, c: (b, 0, 0)),     # scores
            pl.BlockSpec((1, 1, QPAD), lambda b, i, c: (b, 0, 0)),     # labels
            pl.BlockSpec((1, 1, QPAD), lambda b, i, c: (b, 0, 0)),     # keep
        ),
        out_shape=(
            jax.ShapeDtypeStruct((B, Hout, Wp), jnp.int32),
            jax.ShapeDtypeStruct((B, 1, QPAD), jnp.float32),
            jax.ShapeDtypeStruct((B, 1, QPAD), jnp.int32),
            jax.ShapeDtypeStruct((B, 1, QPAD), jnp.int32),
        ),
        scratch_shapes=[pltpu.VMEM((TILE_H, Wp), jnp.float32),   # running best
                        pltpu.VMEM((TILE_H, Wp), jnp.int32)],    # running argmax id
        compiler_params=pltpu.CompilerParams(
            dimension_semantics=("parallel", "arbitrary", "arbitrary"),
            # raise towards 96 MiB on v5e/v6e at production shapes; keep <=32 MiB
            # for the v7x build (64 MiB physical VMEM).
            vmem_limit_bytes=32 * 1024 * 1024),
    )(logits_t, t, wh)
    return m_id[:, :, :Wout], scores, labels, keep


# ----------------------------------------------------------------------------
# host glue
# ----------------------------------------------------------------------------
def bilinear_matrix(out_size, in_size):
    """Interpolation matrix matching F.interpolate(mode='bilinear', align_corners=False)."""
    scale = in_size / out_size
    dst = np.arange(out_size, dtype=np.float64)
    src = np.maximum((dst + 0.5) * scale - 0.5, 0.0)
    i0 = np.minimum(np.floor(src).astype(np.int64), in_size - 1)
    i1 = np.minimum(i0 + 1, in_size - 1)
    frac = src - i0
    W = np.zeros((out_size, in_size), dtype=np.float32)
    W[np.arange(out_size), i0] += (1.0 - frac).astype(np.float32)
    W[np.arange(out_size), i1] += frac.astype(np.float32)
    return W


def post_process_panoptic_batch(pred_logits, pred_masks, is_thing_map,
                                processed_size, target_size=None, threshold=0.85):
    if target_size is None:
        target_size = processed_size
    B, Q, C = pred_logits.shape
    h, w = int(processed_size[0]), int(processed_size[1])

    outs = panoptic_device(pred_logits, pred_masks, processed_size, threshold)
    jax.block_until_ready(outs)
    m_id_d, scores_d, labels_d, keep_d = outs

    m_id_all = np.asarray(m_id_d)                          # (B, h, w) int32
    labels_all = np.asarray(labels_d)[:, 0, :Q]            # (B, Q)
    keep_all = np.asarray(keep_d)[:, 0, :Q].astype(bool)   # (B, Q)
    # scores output retained for parity with the reference (cur_scores).

    preds = []
    for b in range(B):
        labels = labels_all[b]
        keep = keep_all[b]
        m_id_full = m_id_all[b].astype(np.int64)

        kept = np.nonzero(keep)[0]
        if kept.size == 0:
            m_id = np.zeros((h, w), dtype=np.int64)
            cur_classes = np.ones((1,), dtype=np.int64)
            area = []
        else:
            # per-query pixel areas at processed size: host bincount on the id map
            # (already copied to host for the panoptic-API output).
            area_full = np.bincount(m_id_full.ravel(), minlength=Q)[:Q]
            remap = -np.ones((Q,), dtype=np.int64)
            remap[kept] = np.arange(kept.size)
            m_id = remap[m_id_full]                        # compacted query-id space
            cur_classes = labels[kept].astype(np.int64)
            area = area_full[kept].astype(np.int64).copy()

            # dedup: merge "stuff" segments of the same class into the first one
            stuff_equiv = defaultdict(list)
            for k, lab in enumerate(cur_classes):
                if not is_thing_map[int(lab)]:
                    stuff_equiv[int(lab)].append(k)
            for equiv in stuff_equiv.values():
                if len(equiv) > 1:
                    for eq in equiv[1:]:
                        m_id[m_id == eq] = equiv[0]
                        area[equiv[0]] += area[eq]
                        area[eq] = 0
            area = [int(a) for a in area]

        # TODO(synk): NEAREST resize of the id map to target_size via PIL + id2rgb/rgb2id round-trip
        # TODO(synk): iterative removal of segments with area <= 4 and re-running get_ids_area
        # TODO(synk): PNG encoding of the segmentation image ('png_string')

        segments_info = []
        for idx, a in enumerate(area):
            cat = int(cur_classes[idx])
            segments_info.append({'id': idx, 'isthing': bool(is_thing_map[cat]),
                                  'category_id': cat, 'area': int(a)})
        preds.append({'m_id': m_id, 'segments_info': segments_info})
    return preds


# ----------------------------------------------------------------------------
if __name__ == "__main__":
    key = jax.random.PRNGKey(0)
    B, Q, C = 2, 8, 9               # 9 classes, last one = "no object"
    Hm, Wm = 16, 16                 # raw mask resolution
    processed_size = (64, 128)      # Hout x Wout (Wout lane-dense)
    is_thing_map = {i: (i % 2 == 0) for i in range(C)}

    k1, k2 = jax.random.split(key)
    pred_logits = 5.0 * jax.random.normal(k1, (B, Q, C), dtype=jnp.float32)
    pred_masks = jax.random.normal(k2, (B, Q, Hm, Wm), dtype=jnp.float32)

    preds = post_process_panoptic_batch(pred_logits, pred_masks, is_thing_map,
                                        processed_size, threshold=0.85)

    assert len(preds) == B
    for p in preds:
        assert p['m_id'].shape == processed_size
    print("KERNEL_OK")
</pallas_src>

<mosaic_0001>
module attributes {stable_mosaic.version = 11 : i64} {
  func.func @_panoptic_kernel(%arg0: i32, %arg1: i32, %arg2: i32, %arg3: memref<1x9x128xf32, #tpu.memory_space<vmem>>, %arg4: memref<1x16x1024xbf16, #tpu.memory_space<vmem>>, %arg5: memref<64x16xbf16, #tpu.memory_space<vmem>>, %arg6: memref<1x64x128xi32, #tpu.memory_space<vmem>>, %arg7: memref<1x1x128xf32, #tpu.memory_space<vmem>>, %arg8: memref<1x1x128xi32, #tpu.memory_space<vmem>>, %arg9: memref<1x1x128xi32, #tpu.memory_space<vmem>>, %arg10: memref<64x128xf32, #tpu.memory_space<vmem>>, %arg11: memref<64x128xi32, #tpu.memory_space<vmem>>) attributes {dimension_semantics = [#tpu.dimension_semantics<parallel>, #tpu.dimension_semantics<arbitrary>, #tpu.dimension_semantics<arbitrary>], iteration_bounds = array<i64: 2, 1, 1>, scalar_prefetch = 0 : i64, scratch_operands = 2 : i64, tpu.core_type = #tpu.core_type<tc>, window_params = [{transform_indices = @transform_0, window_bounds = array<i64: 1, 9, 128>}, {transform_indices = @transform_1, window_bounds = array<i64: 1, 16, 1024>}, {transform_indices = @transform_2, window_bounds = array<i64: 64, 16>}, {transform_indices = @transform_3, window_bounds = array<i64: 1, 64, 128>}, {transform_indices = @transform_4, window_bounds = array<i64: 1, 1, 128>}, {transform_indices = @transform_5, window_bounds = array<i64: 1, 1, 128>}, {transform_indices = @transform_6, window_bounds = array<i64: 1, 1, 128>}]} {
    %c0_i32 = arith.constant 0 : i32
    %0 = arith.cmpi eq, %arg1, %c0_i32 : i32
    %c0_i32_0 = arith.constant 0 : i32
    %1 = arith.cmpi eq, %arg2, %c0_i32_0 : i32
    %2 = arith.andi %0, %1 : i1
    %3 = arith.extui %2 : i1 to i32
    %c0_i32_1 = arith.constant 0 : i32
    %4 = arith.cmpi ne, %3, %c0_i32_1 : i32
    scf.if %4 {
      %c0_10 = arith.constant 0 : index
      %c0_11 = arith.constant 0 : index
      %c0_12 = arith.constant 0 : index
      %48 = vector.load %arg3[%c0_10, %c0_11, %c0_12] : memref<1x9x128xf32, #tpu.memory_space<vmem>>, vector<1x9x128xf32>
      %49 = vector.shape_cast %48 : vector<1x9x128xf32> to vector<9x128xf32>
      %cst_13 = arith.constant dense<0xFF800000> : vector<128xf32>
      %50 = vector.multi_reduction <maximumf>, %49, %cst_13 [0] : vector<9x128xf32> to vector<128xf32>
      %51 = vector.shape_cast %50 : vector<128xf32> to vector<1x128xf32>
      %52 = vector.broadcast %51 : vector<1x128xf32> to vector<9x128xf32>
      %53 = arith.subf %49, %52 : vector<9x128xf32>
      %54 = math.exp %53 : vector<9x128xf32>
      %cst_14 = arith.constant dense<0.000000e+00> : vector<128xf32>
      %55 = vector.multi_reduction <add>, %54, %cst_14 [0] : vector<9x128xf32> to vector<128xf32>
      %56 = vector.shape_cast %55 : vector<128xf32> to vector<1x128xf32>
      %cst_15 = arith.constant 1.000000e+00 : f32
      %57 = vector.broadcast %cst_15 : f32 to vector<1x128xf32>
      %58 = arith.divf %57, %56 : vector<1x128xf32>
      %59 = tpu.iota {dimensions = array<i32: 0>} : vector<9x128xi32>
      %60 = vector.broadcast %51 : vector<1x128xf32> to vector<9x128xf32>
      %61 = arith.cmpf oge, %49, %60 : vector<9x128xf32>
      %c1073741824_i32 = arith.constant 1073741824 : i32
      %62 = vector.broadcast %c1073741824_i32 : i32 to vector<9x128xi32>
      %63 = arith.select %61, %59, %62 : vector<9x128xi1>, vector<9x128xi32>
      %cst_16 = arith.constant dense<2147483647> : vector<128xi32>
      %64 = vector.multi_reduction <minsi>, %63, %cst_16 [0] : vector<9x128xi32> to vector<128xi32>
      %65 = vector.shape_cast %64 : vector<128xi32> to vector<1x128xi32>
      %c8_i32 = arith.constant 8 : i32
      %66 = vector.broadcast %c8_i32 : i32 to vector<1x128xi32>
      %67 = arith.cmpi ne, %65, %66 : vector<1x128xi32>
      %cst_17 = arith.constant 8.500000e-01 : f32
      %68 = vector.broadcast %cst_17 : f32 to vector<1x128xf32>
      %69 = arith.cmpf ogt, %58, %68 : vector<1x128xf32>
      %70 = arith.andi %67, %69 : vector<1x128xi1>
      %c0_18 = arith.constant 0 : index
      %c0_19 = arith.constant 0 : index
      %c0_20 = arith.constant 0 : index
      %71 = vector.load %arg7[%c0_18, %c0_19, %c0_20] : memref<1x1x128xf32, #tpu.memory_space<vmem>>, vector<1x1x128xf32>
      %72 = vector.shape_cast %71 : vector<1x1x128xf32> to vector<1x128xf32>
      %73 = vector.shape_cast %58 : vector<1x128xf32> to vector<1x1x128xf32>
      tpu.vector_store %arg7[%c0_18, %c0_19, %c0_20], %73 {strides = array<i32>} : memref<1x1x128xf32, #tpu.memory_space<vmem>>, vector<1x1x128xf32>,
      %c0_21 = arith.constant 0 : index
      %c0_22 = arith.constant 0 : index
      %c0_23 = arith.constant 0 : index
      %74 = vector.load %arg8[%c0_21, %c0_22, %c0_23] : memref<1x1x128xi32, #tpu.memory_space<vmem>>, vector<1x1x128xi32>
      %75 = vector.shape_cast %74 : vector<1x1x128xi32> to vector<1x128xi32>
      %76 = vector.shape_cast %65 : vector<1x128xi32> to vector<1x1x128xi32>
      tpu.vector_store %arg8[%c0_21, %c0_22, %c0_23], %76 {strides = array<i32>} : memref<1x1x128xi32, #tpu.memory_space<vmem>>, vector<1x1x128xi32>,
      %77 = arith.extui %70 : vector<1x128xi1> to vector<1x128xi32>
      %c0_24 = arith.constant 0 : index
      %c0_25 = arith.constant 0 : index
      %c0_26 = arith.constant 0 : index
      %78 = vector.load %arg9[%c0_24, %c0_25, %c0_26] : memref<1x1x128xi32, #tpu.memory_space<vmem>>, vector<1x1x128xi32>
      %79 = vector.shape_cast %78 : vector<1x1x128xi32> to vector<1x128xi32>
      %80 = vector.shape_cast %77 : vector<1x128xi32> to vector<1x1x128xi32>
      tpu.vector_store %arg9[%c0_24, %c0_25, %c0_26], %80 {strides = array<i32>} : memref<1x1x128xi32, #tpu.memory_space<vmem>>, vector<1x1x128xi32>,
    } else {
    }
    %c0 = arith.constant 0 : index
    %c0_2 = arith.constant 0 : index
    %5 = vector.load %arg5[%c0, %c0_2] : memref<64x16xbf16, #tpu.memory_space<vmem>>, vector<64x16xbf16>
    %c0_3 = arith.constant 0 : index
    %c0_4 = arith.constant 0 : index
    %c0_5 = arith.constant 0 : index
    %6 = vector.load %arg4[%c0_3, %c0_4, %c0_5] : memref<1x16x1024xbf16, #tpu.memory_space<vmem>>, vector<1x16x1024xbf16>
    %7 = vector.shape_cast %6 : vector<1x16x1024xbf16> to vector<16x1024xbf16>
    %cst = arith.constant dense<0.000000e+00> : vector<64x1024xf32>
    %8 = tpu.matmul %5, %7, %cst {dimension_numbers = #tpu.dot_dimension_numbers<[1], [0], [0], [1], [0, 0, 1, 1], [], []>} : vector<64x16xbf16>, vector<16x1024xbf16>, vector<64x1024xf32> -> vector<64x1024xf32>
    %9 = vector.extract_strided_slice %8 {offsets = [0, 0], sizes = [64, 128], strides = [1, 1]} : vector<64x1024xf32> to vector<64x128xf32>
    %c0_i32_6 = arith.constant 0 : i32
    %10 = vector.broadcast %c0_i32_6 : i32 to vector<64x128xi32>
    %11 = vector.extract_strided_slice %8 {offsets = [0, 128], sizes = [64, 128], strides = [1, 1]} : vector<64x1024xf32> to vector<64x128xf32>
    %12 = arith.cmpf ogt, %11, %9 : vector<64x128xf32>
    %13 = arith.select %12, %11, %9 : vector<64x128xi1>, vector<64x128xf32>
    %c1_i32 = arith.constant 1 : i32
    %14 = vector.broadcast %c1_i32 : i32 to vector<64x128xi32>
    %15 = arith.select %12, %14, %10 : vector<64x128xi1>, vector<64x128xi32>
    %16 = vector.extract_strided_slice %8 {offsets = [0, 256], sizes = [64, 128], strides = [1, 1]} : vector<64x1024xf32> to vector<64x128xf32>
    %17 = arith.cmpf ogt, %16, %13 : vector<64x128xf32>
    %18 = arith.select %17, %16, %13 : vector<64x128xi1>, vector<64x128xf32>
    %c2_i32 = arith.constant 2 : i32
    %19 = vector.broadcast %c2_i32 : i32 to vector<64x128xi32>
    %20 = arith.select %17, %19, %15 : vector<64x128xi1>, vector<64x128xi32>
    %21 = vector.extract_strided_slice %8 {offsets = [0, 384], sizes = [64, 128], strides = [1, 1]} : vector<64x1024xf32> to vector<64x128xf32>
    %22 = arith.cmpf ogt, %21, %18 : vector<64x128xf32>
    %23 = arith.select %22, %21, %18 : vector<64x128xi1>, vector<64x128xf32>
    %c3_i32 = arith.constant 3 : i32
    %24 = vector.broadcast %c3_i32 : i32 to vector<64x128xi32>
    %25 = arith.select %22, %24, %20 : vector<64x128xi1>, vector<64x128xi32>
    %26 = vector.extract_strided_slice %8 {offsets = [0, 512], sizes = [64, 128], strides = [1, 1]} : vector<64x1024xf32> to vector<64x128xf32>
    %27 = arith.cmpf ogt, %26, %23 : vector<64x128xf32>
    %28 = arith.select %27, %26, %23 : vector<64x128xi1>, vector<64x128xf32>
    %c4_i32 = arith.constant 4 : i32
    %29 = vector.broadcast %c4_i32 : i32 to vector<64x128xi32>
    %30 = arith.select %27, %29, %25 : vector<64x128xi1>, vector<64x128xi32>
    %31 = vector.extract_strided_slice %8 {offsets = [0, 640], sizes = [64, 128], strides = [1, 1]} : vector<64x1024xf32> to vector<64x128xf32>
    %32 = arith.cmpf ogt, %31, %28 : vector<64x128xf32>
    %33 = arith.select %32, %31, %28 : vector<64x128xi1>, vector<64x128xf32>
    %c5_i32 = arith.constant 5 : i32
    %34 = vector.broadcast %c5_i32 : i32 to vector<64x128xi32>
    %35 = arith.select %32, %34, %30 : vector<64x128xi1>, vector<64x128xi32>
    %36 = vector.extract_strided_slice %8 {offsets = [0, 768], sizes = [64, 128], strides = [1, 1]} : vector<64x1024xf32> to vector<64x128xf32>
    %37 = arith.cmpf ogt, %36, %33 : vector<64x128xf32>
    %38 = arith.select %37, %36, %33 : vector<64x128xi1>, vector<64x128xf32>
    %c6_i32 = arith.constant 6 : i32
    %39 = vector.broadcast %c6_i32 : i32 to vector<64x128xi32>
    %40 = arith.select %37, %39, %35 : vector<64x128xi1>, vector<64x128xi32>
    %41 = vector.extract_strided_slice %8 {offsets = [0, 896], sizes = [64, 128], strides = [1, 1]} : vector<64x1024xf32> to vector<64x128xf32>
    %42 = arith.cmpf ogt, %41, %38 : vector<64x128xf32>
    %c7_i32 = arith.constant 7 : i32
    %43 = vector.broadcast %c7_i32 : i32 to vector<64x128xi32>
    %44 = arith.select %42, %43, %40 : vector<64x128xi1>, vector<64x128xi32>
    %c0_7 = arith.constant 0 : index
    %c0_8 = arith.constant 0 : index
    %c0_9 = arith.constant 0 : index
    %45 = vector.load %arg6[%c0_7, %c0_8, %c0_9] : memref<1x64x128xi32, #tpu.memory_space<vmem>>, vector<1x64x128xi32>
    %46 = vector.shape_cast %45 : vector<1x64x128xi32> to vector<64x128xi32>
    %47 = vector.shape_cast %44 : vector<64x128xi32> to vector<1x64x128xi32>
    tpu.vector_store %arg6[%c0_7, %c0_8, %c0_9], %47 {strides = array<i32>} : memref<1x64x128xi32, #tpu.memory_space<vmem>>, vector<1x64x128xi32>,
    return
  }
  func.func @transform_0(%arg0: i32, %arg1: i32, %arg2: i32) -> (i32, i32, i32) {
    %c0_i32 = arith.constant 0 : i32
    %c0_i32_0 = arith.constant 0 : i32
    %c0_i32_1 = arith.constant 0 : i32
    return %arg0, %c0_i32, %c0_i32_0 : i32, i32, i32
  }
  func.func @transform_1(%arg0: i32, %arg1: i32, %arg2: i32) -> (i32, i32, i32) {
    %c0_i32 = arith.constant 0 : i32
    %c0_i32_0 = arith.constant 0 : i32
    return %arg0, %c0_i32, %arg2 : i32, i32, i32
  }
  func.func @transform_2(%arg0: i32, %arg1: i32, %arg2: i32) -> (i32, i32) {
    %c0_i32 = arith.constant 0 : i32
    %c0_i32_0 = arith.constant 0 : i32
    return %arg1, %c0_i32 : i32, i32
  }
  func.func @transform_3(%arg0: i32, %arg1: i32, %arg2: i32) -> (i32, i32, i32) {
    %c0_i32 = arith.constant 0 : i32
    %c0_i32_0 = arith.constant 0 : i32
    return %arg0, %arg1, %c0_i32 : i32, i32, i32
  }
  func.func @transform_4(%arg0: i32, %arg1: i32, %arg2: i32) -> (i32, i32, i32) {
    %c0_i32 = arith.constant 0 : i32
    %c0_i32_0 = arith.constant 0 : i32
    %c0_i32_1 = arith.constant 0 : i32
    return %arg0, %c0_i32, %c0_i32_0 : i32, i32, i32
  }
  func.func @transform_5(%arg0: i32, %arg1: i32, %arg2: i32) -> (i32, i32, i32) {
    %c0_i32 = arith.constant 0 : i32
    %c0_i32_0 = arith.constant 0 : i32
    %c0_i32_1 = arith.constant 0 : i32
    return %arg0, %c0_i32, %c0_i32_0 : i32, i32, i32
  }
  func.func @transform_6(%arg0: i32, %arg1: i32, %arg2: i32) -> (i32, i32, i32) {
    %c0_i32 = arith.constant 0 : i32
    %c0_i32_0 = arith.constant 0 : i32
    %c0_i32_1 = arith.constant 0 : i32
    return %arg0, %c0_i32, %c0_i32_0 : i32, i32, i32
  }
}

</mosaic_0001>

<bundles_post_ra>
// kernel: tpu_custom_call.1
= control target key start
LH: loop header
LB: loop body
LE: loop exit
PB: predicated region body
PF: predicated region fallthrough
CT: control target
= control target key end

     0   :  { %12 = vsyncpa [#allocation5], 0  ;;  %s2081_s0 = inlined_call_operand.vmem [shape: f32[2,9,128], index: 0, kind: input, shape index: {}]   ;;  %s2082_s1 = inlined_call_operand.hbm [shape: bf16[2,16,1024], index: 1, kind: input, shape index: {}]   ;;  %s2083_s2 = inlined_call_operand.vmem [shape: bf16[64,16], index: 2, kind: input, shape index: {}]   ;;  %s2084_s3 = inlined_call_operand.hbm [shape: s32[2,64,128], index: 3, kind: output, shape index: {0}]   ;;  %s2085_s4 = inlined_call_operand.hbm [shape: f32[2,1,128], index: 4, kind: output, shape index: {1}]   ;;  %s2086_s5 = inlined_call_operand.hbm [shape: s32[2,1,128], index: 5, kind: output, shape index: {2}]   ;;  %s2087_s6 = inlined_call_operand.hbm [shape: s32[2,1,128], index: 6, kind: output, shape index: {3}]  }
   0x1   :  { %14 = vsyncpa [#allocation5 + $0x1], 0 }
   0x2   :  { %15 = vsyncpa [#allocation6], 0 }
   0x3   :  { %17 = vsyncpa [#allocation6 + $0x1], 0 }
   0x4   :  { %18 = vsyncpa [#allocation9], 0 }
   0x5   :  { %20 = vsyncpa [#allocation9 + $0x1], 0 }
   0x6   :  { %21 = vsyncpa [#allocation12], 0 }
   0x7   :  { %23 = vsyncpa [#allocation12 + $0x1], 0  ;;  %s1623_s21 = smov 0   ;;  %s1625_s22 = smov 0  }
   0x8   :  { %s1627_s23 = smov 0   ;;  %s1629_s24 = smov 0  }
   0x9   :  { %s1631_s25 = smov 0   ;;  %s1633_s26 = smov 0  }
   0xa LB: > { %s1654_s27 = sadd.s32 4294967295, %s1576_s26   ;;  %s2088_s28 = sadd.s32 4294967294, %s1576_s26   ;;  %s1576_s26 = sphi %s1633_s26, %s29_s26   ;;  %s1572_s25 = sphi %s1631_s25, %s2107_s25   ;;  %s1568_s24 = sphi %s1629_s24, %s2106_s24   ;;  %s1564_s23 = sphi %s1627_s23, %s2105_s23   ;;  %s1560_s22 = sphi %s1625_s22, %s2104_s22   ;;  %s1556_s21 = sphi %s1623_s21, %s2103_s21  }
   0xb   : > { %s48_s29 = sadd.s32 1, %s1572_s25  ;;  %s83_s30 = sadd.s32 1, %s1564_s23 }
   0xc   : > { %p50_p0 = scmp.ge.s32.totalorder %s48_s29, 2  ;;  %p90_p1 = scmp.ne.s32.totalorder %s1564_s23, %s1560_s22 }
   0xd   : > { %p91_p2 = scmp.eq.s32.totalorder %s1576_s26, 0  ;;  %p96_p3 = scmp.ne.s32.totalorder %s1560_s22, %s1556_s21 }
   0xe   : > { %s2109_s29 = smov (%p50_p0, %s48_s29), 0  ;;  %p97_p5 = scmp.eq.s32.totalorder %s1654_s27, 0 }
   0xf   : > { %2091 = sst [smem:[#allocation17_spill]] %s2109_s29  ;;  %p1666_p4 = por %p91_p2, %p90_p1 }
  0x10   : > { %s78_s8 = ssub.s32 %s1572_s25, %s2109_s29  ;;  %p148_p6 = scmp.eq.s32.totalorder %s1654_s27, 1 }
  0x11   : > { %p81_p7 = scmp.eq.s32.totalorder %s78_s8, 0  ;;  %p1674_p8 = por %p97_p5, %p96_p3 }
  0x12   : > { %p1678_p9 = por %p148_p6, %p90_p1  ;;  %p154_p10 = scmp.eq.s32.totalorder %s2088_s28, 1 }
  0x13   : > { %s1685_s11 = scalar_select %p81_p7, %s1564_s23, %s83_s30  }
  0x14   : > { %p1687_p11 = por %p154_p10, %p96_p3  ;;  %p1317_p13 = scmp.lt.s32.totalorder %s1576_s26, 2 }
  0x15   : > { %s269_s13 = sand.u32 1, %s1564_s23   ;;  %s1287_s15 = sshll.u32 %s1572_s25, 10 }
  0x16   : > { %s1243_s14 = sshll.u32 %s269_s13, 6  ;;  %s281_s18 = scalar_lea.hbm %s2082_s1, %s1287_s15 }
  0x17   : > { %s273_s19 = scalar_lea.vmem [#allocation4], %s1243_s14  ;;  %p1700_p0 = pnand %p1317_p13, %p1666_p4 }
  0x18   : > { %s282_s20 = sshll.u32 %s273_s19, 4  ;;  %p1246_p1 = scmp.ge.s32.totalorder %s1576_s26, 1  ;;  %s283_s20 = int_to_ptr.vmem [resolvable:$true] %s282_s20 }
  0x19   : > { %s270_s8 = scalar_lea.sflag [#allocation5], %s269_s13  ;;  %p1384_p2 = pneg %p1700_p0 }
  0x1a   : > { %s1395_s28 = scalar_lea.vmem %s283_s20, 1024  ;;  %s1578_s29 = smov [#allocation4]  }
  0x1b   : > { %p1396_p3 = scmp.ne.s32.totalorder %s283_s20, %s1395_s28  ;;  %s1400_s16 = sshll.u32 %s1578_s29, 4  ;;  %s1401_s16 = int_to_ptr.vmem [resolvable:$false] %s1400_s16 }
  0x1c   : > { %s1402_s14 = scalar_lea.vmem %s1401_s16, 2048  ;;  %p1403_p7 = scmp.lt.s32.totalorder %s283_s20, %s1401_s16 }
  0x1d   : > { %p1398_p5 = pnand %p1396_p3, %p1384_p2  ;;  %p1404_p10 = scmp.lt.s32.totalorder %s1402_s14, %s1395_s28 }
  0x1f   : > { %p1399_p6 = pneg %p1398_p5  ;;  %p1405_p12 = por %p1404_p10, %p1403_p7 }
  0x21   : > { %p1406_p4 = pnand %p1405_p12, %p1399_p6 }
  0x23   : > { %1409 = shalt.err (!%p1406_p4)
}
  0x24   : > { %s1579_s7 = smov 512   ;;  %s1580_s13 = smov 32  }
  0x25   : > { %1303 = dma.hbm_to_vmem [thread:$0]  (!%p1700_p0), %s281_s18, 1024, %s283_s20, %s270_s8, %s1579_s7, %s1579_s7, %s1580_s13  }
  0x26   : > { %p290_p13 = scmp.lt.s32.totalorder %s1576_s26, 3 }
  0x28   : > { %p291_p2 = pnand %p1246_p1, %p290_p13 }
  0x29   : > { %s1713_s29 = sand.u32 (!%p291_p2), 1, %s1560_s22  }
  0x2a   : > { %294 = sbr.rel (%p291_p2) target bundleno = 331 (0x14b), region = 32  ;;  %s2090_s28 = sshll.u32 (!%p291_p2), %s1713_s29, 6 }
  0x2b   : > { %s297_s15 = scalar_lea.sflag (!%p291_p2), [#allocation5], %s1713_s29  ;;  %s300_s17 = scalar_lea.vmem (!%p291_p2), [#allocation4], %s2090_s28 }
  0x2f   : > { %1539 = dma.done.wait (%p1674_p8), %s297_s15, 1024  }
  0x30   : > { %1541 = vsyncadd (%p1674_p8), %s297_s15, 4294966272  ;;  %v1581_v0 = vmov 0   ;;  %v432_v1 = vld [vmem:[%s300_s17] sm:$0xff]  ;;  %v433_v3 = vld [vmem:[%s300_s17 + $0x8] sm:$0xff]  ;;  %vm500_vm0 = vcmask 130048   ;;  %p351_p8 = scmp.lt.s32.totalorder %s1568_s24, 1  ;;  %v398_v42 = vlaneseq }
  0x31   : > { %545 = vmatprep.mubr.bf16.mxu0 %v1581_v0  ;;  %618 = vmatprep.mubr.bf16.mxu1 %v1581_v0  ;;  %v436_v2 = vld [vmem:[%s300_s17 + $0x20] sm:$0xff]  ;;  %v437_v5 = vld [vmem:[%s300_s17 + $0x28] sm:$0xff]  ;;  %v434_v10 = vld [vmem:[%s300_s17 + $0x10] sm:$0xff]  ;;  %vm373_vm1 = vcmask 1040384   ;;  %s338_s19 = scalar_lea.vmem [#allocation8], %s1713_s29  ;;  %s978_s9 = sand.u32 1, %s1654_s27  }
  0x32   : > { %v1256_v4 = vcombine.high %v432_v1, %v436_v2  ;;  %v1255_v6 = vcombine.low %v432_v1, %v436_v2  ;;  %v1258_v7 = vcombine.high %v433_v3, %v437_v5  ;;  %v1257_v8 = vcombine.low %v433_v3, %v437_v5  ;;  %v1372_v9 = vld [vmem:[%s2083_s2] sm:$0xff]   ;;  %v438_v11 = vld [vmem:[%s300_s17 + $0x30] sm:$0xff]  ;;  %v435_v13 = vld [vmem:[%s300_s17 + $0x18] sm:$0xff]  ;;  %s352_s7 = scalar_select %p351_p8, %s1568_s24, 1 }
  0x33   : > { %v1260_v12 = vcombine.high %v434_v10, %v438_v11  ;;  %v439_v14 = vld [vmem:[%s300_s17 + $0x38] sm:$0xff]  ;;  %v1259_v15 = vcombine.low %v434_v10, %v438_v11  ;;  %v1373_v18 = vld [vmem:[%s2083_s2 + $0x8] sm:$0xff]   ;;  %v1374_v19 = vld [vmem:[%s2083_s2 + $0x10] sm:$0xff]   ;;  %v399_v44 = vshrl.u32 %v398_v42, 7  ;;  %s1778_s20 = sshll.u32 %s1568_s24, 4  ;;  %s1017_s14 = sshll.u32 %s338_s19, 4  ;;  %s1018_s14 = int_to_ptr.vmem [resolvable:$true] %s1017_s14 }
  0x34   : > { %527 = vmatprep.subr.bf16.mxu0 %v1256_v4  ;;  %600 = vmatprep.subr.bf16.mxu1 %v1258_v7  ;;  %v1262_v16 = vcombine.high %v435_v13, %v439_v14  ;;  %v1261_v17 = vcombine.low %v435_v13, %v439_v14  ;;  %v1375_v20 = vld [vmem:[%s2083_s2 + $0x18] sm:$0xff]   ;;  %s1288_s13 = sshll.u32 %s352_s7, 4  ;;  %s1784_s16 = scalar_lea.hbm %s2085_s4, %s1778_s20 }
  0x35   : > { %528 = vmatpush1.bf16.msra.mxu0 %v1255_v6  ;;  %601 = vmatpush1.bf16.msra.mxu1 %v1257_v8  ;;  %s355_s18 = scalar_lea.vmem %s2081_s0, %s1288_s13  ;;  %v400_v46 = vadd.s32 8, %v399_v44  ;;  %s1790_s7 = scalar_lea.sflag [#allocation9], %s978_s9 }
  0x36   : > { %673 = vmatprep.subr.bf16.mxu0 %v1260_v12  ;;  %746 = vmatprep.subr.bf16.mxu1 %v1262_v16  ;;  %v372_v21 = vld [vmem:[%s355_s18 + $0x8] sm:$0x1]  ;;  %v371_v22 = vld [vmem:[%s355_s18] sm:$0xff]  ;;  %s1410_s13 = scalar_lea.vmem %s1018_s14, 16  ;;  %s1582_s27 = smov [#allocation8]  }
  0x37   : > { %v374_v23 = vsel %vm373_vm1, %v372_v21, -inf  ;;  %p1411_p12 = scmp.ne.s32.totalorder %s1018_s14, %s1410_s13  ;;  %s1414_s15 = sshll.u32 %s1582_s27, 4  ;;  %s1415_s15 = int_to_ptr.vmem [resolvable:$false] %s1414_s15 }
  0x38   : > { %1263 = vmatmul.mubr.msk.bf16.vlgmr.msra.gmra.mxu0 %vm500_vm0, %v1372_v9  ;;  %1267 = vmatmul.mubr.msk.bf16.vlgmr.msra.gmra.mxu1 %vm500_vm0, %v1372_v9  ;;  %v375_v24 = vmax.f32 %v371_v22, %v374_v23  ;;  %s1416_s17 = scalar_lea.vmem %s1415_s15, 32  ;;  %p1417_p3 = scmp.lt.s32.totalorder %s1018_s14, %s1415_s15 }
  0x39   : > { %674 = vmatpush1.bf16.msra.mxu0 %v1259_v15  ;;  %747 = vmatpush1.bf16.msra.mxu1 %v1261_v17  ;;  %p1412_p0 = pnand %p1411_p12, %p1678_p9  ;;  %p1418_p5 = scmp.lt.s32.totalorder %s1416_s17, %s1410_s13 }
  0x3a   : > { %555 = vmatprep.mubr.bf16.mxu0 %v1581_v0  ;;  %628 = vmatprep.mubr.bf16.mxu1 %v1581_v0  ;;  %v376_v25 = vrot.slane %v375_v24, 4 }
  0x3b   : > { %p1413_p1 = pneg %p1412_p0  ;;  %p1419_p6 = por %p1418_p5, %p1417_p3 }
  0x3c   : > { %v377_v26 = vmax.f32 %v375_v24, %v376_v25 }
  0x3d   : > { %p1420_p7 = pnand %p1419_p6, %p1413_p1 }
  0x3e   : > { %v378_v27 = vrot.slane %v377_v26, 2 }
  0x40   : > { %1264 = vmatmul.mubr.msk.bf16.gmra.mxu0 %vm500_vm0, %v1373_v18  ;;  %1268 = vmatmul.mubr.msk.bf16.gmra.mxu1 %vm500_vm0, %v1373_v18  ;;  %v379_v28 = vmax.f32 %v377_v26, %v378_v27 }
  0x41   : > { %565 = vmatprep.mubr.bf16.mxu0 %v1581_v0  ;;  %638 = vmatprep.mubr.bf16.mxu1 %v1581_v0 }
  0x42   : > { %v380_v29 = vrot.slane %v379_v28, 1 }
  0x44   : > { %v381_v30 = vmax.f32 %v379_v28, %v380_v29 }
  0x46   : > { %v383_v31 = vsub.f32 %v372_v21, %v381_v30  ;;  %v382_v32 = vsub.f32 %v371_v22, %v381_v30  ;;  %vm402_vm2 = vcmp.ge.f32.partialorder %v372_v21, %v381_v30  ;;  %vm401_vm3 = vcmp.ge.f32.partialorder %v371_v22, %v381_v30 }
  0x47   : > { %v404_v48 = vsel %vm402_vm2, %v400_v46, 1073741824  ;;  %v403_v49 = vsel %vm401_vm3, %v399_v44, 1073741824 }
  0x48   : > { %1265 = vmatmul.mubr.msk.bf16.gmra.mxu0 %vm500_vm0, %v1374_v19  ;;  %1269 = vmatmul.mubr.msk.bf16.gmra.mxu1 %vm500_vm0, %v1374_v19  ;;  %v386_v33 = vmul.f32 1.442695, %v383_v31  ;;  %v384_v34 = vmul.f32 1.442695, %v382_v32  ;;  %v405_v50 = vsel %vm373_vm1, %v404_v48, 2147483647 }
  0x49   : > { %575 = vmatprep.mubr.bf16.mxu0 %v1581_v0  ;;  %648 = vmatprep.mubr.bf16.mxu1 %v1581_v0  ;;  %vm406_vm4 = vcmp.lt.s32.totalorder %v403_v49, %v405_v50 }
  0x4a   : > { %1376 = vpow2.f32 %v386_v33  ;;  %v407_v51 = vsel %vm406_vm4, %v403_v49, %v405_v50 }
  0x4b   : > { %1378 = vpow2.f32 %v384_v34  ;;  %v408_v52 = vrot.slane %v407_v51, 4 }
  0x4d   : > { %vm409_vm5 = vcmp.lt.s32.totalorder %v407_v51, %v408_v52 }
  0x4e   : > { %v410_v53 = vsel %vm409_vm5, %v407_v51, %v408_v52 }
  0x4f   : > { %v411_v54 = vrot.slane %v410_v53, 2 }
  0x50   : > { %1266 = vmatmul.mubr.msk.bf16.gmra.mxu0 %vm500_vm0, %v1375_v20  ;;  %1270 = vmatmul.mubr.msk.bf16.gmra.mxu1 %vm500_vm0, %v1375_v20 }
  0x51   : > { %691 = vmatprep.mubr.bf16.mxu0 %v1581_v0  ;;  %764 = vmatprep.mubr.bf16.mxu1 %v1581_v0  ;;  %vm412_vm6 = vcmp.lt.s32.totalorder %v410_v53, %v411_v54 }
  0x52   : > { %v413_v55 = vsel %vm412_vm6, %v410_v53, %v411_v54 }
  0x53   : > { %v414_v56 = vrot.slane %v413_v55, 1 }
  0x55   : > { %vm415_vm7 = vcmp.lt.s32.totalorder %v413_v55, %v414_v56 }
  0x56   : > { %v416_v58 = vsel %vm415_vm7, %v413_v55, %v414_v56 }
  0x57   : > { %v1377_v35 = vpop.eup %1376  ;;  %vm417_vm8 = vcmp.ne.s32.totalorder %v416_v58, 8 }
  0x58   : > { %1271 = vmatmul.mubr.msk.bf16.vlgmr.msra.gmra.mxu0 %vm500_vm0, %v1372_v9  ;;  %1275 = vmatmul.mubr.msk.bf16.vlgmr.msra.gmra.mxu1 %vm500_vm0, %v1372_v9  ;;  %v1379_v36 = vpop.eup %1378  ;;  %v388_v37 = vsel %vm373_vm1, %v1377_v35, 0.0 }
  0x59   : > { %701 = vmatprep.mubr.bf16.mxu0 %v1581_v0  ;;  %774 = vmatprep.mubr.bf16.mxu1 %v1581_v0  ;;  %v389_v38 = vadd.f32 %v1379_v36, %v388_v37 }
  0x5b   : > { %v390_v39 = vrot.slane %v389_v38, 4 }
  0x5d   : > { %v391_v40 = vadd.f32 %v390_v39, %v389_v38 }
  0x5f   : > { %v392_v41 = vrot.slane %v391_v40, 2 }
  0x60   : > { %1272 = vmatmul.mubr.msk.bf16.gmra.mxu0 %vm500_vm0, %v1373_v18  ;;  %1276 = vmatmul.mubr.msk.bf16.gmra.mxu1 %vm500_vm0, %v1373_v18 }
  0x61   : > { %711 = vmatprep.mubr.bf16.mxu0 %v1581_v0  ;;  %784 = vmatprep.mubr.bf16.mxu1 %v1581_v0  ;;  %v393_v43 = vadd.f32 %v392_v41, %v391_v40 }
  0x63   : > { %v394_v45 = vrot.slane %v393_v43, 1 }
  0x65   : > { %v395_v47 = vadd.f32 %v394_v45, %v393_v43 }
  0x67   : > { %1380 = vrcp.f32 %v395_v47 }
  0x68   : > { %1273 = vmatmul.mubr.msk.bf16.gmra.mxu0 %vm500_vm0, %v1374_v19  ;;  %1277 = vmatmul.mubr.msk.bf16.gmra.mxu1 %vm500_vm0, %v1374_v19 }
  0x69   : > { %721 = vmatprep.mubr.bf16.mxu0 %v1581_v0  ;;  %794 = vmatprep.mubr.bf16.mxu1 %v1581_v0 }
  0x70   : > { %1274 = vmatmul.mubr.msk.bf16.gmra.mxu0 %vm500_vm0, %v1375_v20  ;;  %1278 = vmatmul.mubr.msk.bf16.gmra.mxu1 %vm500_vm0, %v1375_v20 }
  0x74   : > { %v1381_v57 = vpop.eup %1380 }
  0x75   : > { %420 = vst [vmem:[%s338_s19] sm:$0x1] %v1381_v57  ;;  %vm418_vm9 = vcmp.gt.f32.partialorder %v1381_v57, 0.85 }
  0x76   : > { %vm1786_vm10 = vmand %vm417_vm8, %vm418_vm9 }
  0x77   : > { %1423 = shalt.err (!%p1420_p7)
}
  0x78   : > { %s1424_s18 = scalar_lea.hbm %s1784_s16, 16  ;;  %s1428_s30 = scalar_lea.hbm %s2085_s4, 32 }
  0x79   : > { %p1425_p10 = scmp.ne.s32.totalorder %s1784_s16, %s1424_s18  ;;  %p1429_p2 = scmp.lt.s32.totalorder %s1784_s16, %s2085_s4 }
  0x7a   : > { %p1430_p8 = scmp.lt.s32.totalorder %s1428_s30, %s1424_s18 }
  0x7b   : > { %p1426_p4 = pnand %p1425_p10, %p1678_p9 }
  0x7c   : > { %p1431_p12 = por %p1430_p8, %p1429_p2 }
  0x7d   : > { %p1427_p13 = pneg %p1426_p4 }
  0x7f   : > { %p1432_p0 = pnand %p1431_p12, %p1427_p13 }
  0x81   : > { %1435 = shalt.err (!%p1432_p0)
}
  0x82   : > { %1293 = dma.vmem_to_hbm [thread:$0]  (%p1678_p9), %s1018_s14, 16, %s1784_s16, %s1790_s7   ;;  %v422_v60 = vsel %vm1786_vm10, 1, %v1581_v0 }
  0x83   : > { %s344_s13 = scalar_lea.vmem [#allocation10], %s1713_s29  ;;  %s1028_s18 = scalar_lea.hbm %s2086_s5, %s1778_s20 }
  0x84   : > { %421 = vst [vmem:[%s344_s13] sm:$0x1] %v416_v58  ;;  %s1030_s19 = sshll.u32 %s344_s13, 4  ;;  %s1583_s30 = smov [#allocation10]   ;;  %s1031_s19 = int_to_ptr.vmem [resolvable:$true] %s1030_s19 }
  0x85   : > { %s1436_s9 = scalar_lea.vmem %s1031_s19, 16  ;;  %s1440_s8 = sshll.u32 %s1583_s30, 4  ;;  %s1441_s8 = int_to_ptr.vmem [resolvable:$false] %s1440_s8 }
  0x86   : > { %p1437_p1 = scmp.ne.s32.totalorder %s1031_s19, %s1436_s9  ;;  %s1442_s16 = scalar_lea.vmem %s1441_s8, 32 }
  0x87   : > { %p1443_p6 = scmp.lt.s32.totalorder %s1031_s19, %s1441_s8  ;;  %p1444_p7 = scmp.lt.s32.totalorder %s1442_s16, %s1436_s9 }
  0x88   : > { %p1438_p3 = pnand %p1437_p1, %p1678_p9 }
  0x89   : > { %p1445_p10 = por %p1444_p7, %p1443_p6 }
  0x8a   : > { %p1439_p5 = pneg %p1438_p3 }
  0x8c   : > { %p1446_p4 = pnand %p1445_p10, %p1439_p5 }
  0x8e   : > { %1449 = shalt.err (!%p1446_p4)
}
  0x8f   : > { %s1450_s14 = scalar_lea.hbm %s1028_s18, 16  ;;  %s1454_s15 = scalar_lea.hbm %s2086_s5, 32 }
  0x90   : > { %p1451_p13 = scmp.ne.s32.totalorder %s1028_s18, %s1450_s14  ;;  %p1455_p12 = scmp.lt.s32.totalorder %s1028_s18, %s2086_s5 }
  0x91   : > { %p1456_p0 = scmp.lt.s32.totalorder %s1454_s15, %s1450_s14 }
  0x92   : > { %p1452_p2 = pnand %p1451_p13, %p1678_p9 }
  0x93   : > { %p1457_p1 = por %p1456_p0, %p1455_p12 }
  0x94   : > { %p1453_p8 = pneg %p1452_p2 }
  0x96   : > { %p1458_p3 = pnand %p1457_p1, %p1453_p8 }
  0x98   : > { %1461 = shalt.err (!%p1458_p3)
}
  0x99   : > { %1294 = dma.vmem_to_hbm [thread:$0]  (%p1678_p9), %s1031_s19, 16, %s1028_s18, %s1790_s7  }
  0x9a   : > { %s350_s9 = scalar_lea.vmem [#allocation11], %s1713_s29  ;;  %s1041_s16 = scalar_lea.hbm %s2087_s6, %s1778_s20 }
  0x9b   : > { %423 = vst [vmem:[%s350_s9] sm:$0x1] %v422_v60  ;;  %s1043_s28 = sshll.u32 %s350_s9, 4  ;;  %s987_s14 = scalar_lea.sflag [#allocation12], %s1713_s29  ;;  %s1044_s28 = int_to_ptr.vmem [resolvable:$true] %s1043_s28 }
  0x9c   : > { %s1462_s27 = scalar_lea.vmem %s1044_s28, 16  ;;  %s1584_s13 = smov [#allocation11]  }
  0x9d   : > { %p1463_p5 = scmp.ne.s32.totalorder %s1044_s28, %s1462_s27  ;;  %s1466_s15 = sshll.u32 %s1584_s13, 4  ;;  %s1467_s15 = int_to_ptr.vmem [resolvable:$false] %s1466_s15 }
  0x9e   : > { %s1468_s17 = scalar_lea.vmem %s1467_s15, 32  ;;  %p1469_p10 = scmp.lt.s32.totalorder %s1044_s28, %s1467_s15 }
  0x9f   : > { %p1464_p6 = pnand %p1463_p5, %p1678_p9  ;;  %p1470_p4 = scmp.lt.s32.totalorder %s1468_s17, %s1462_s27 }
  0xa1   : > { %p1465_p7 = pneg %p1464_p6  ;;  %p1471_p13 = por %p1470_p4, %p1469_p10 }
  0xa3   : > { %p1472_p2 = pnand %p1471_p13, %p1465_p7 }
  0xa5   : > { %1475 = shalt.err (!%p1472_p2)
}
  0xa6   : > { %s1476_s7 = scalar_lea.hbm %s1041_s16, 16  ;;  %s1480_s19 = scalar_lea.hbm %s2087_s6, 32 }
  0xa7   : > { %p1477_p8 = scmp.ne.s32.totalorder %s1041_s16, %s1476_s7  ;;  %p1481_p1 = scmp.lt.s32.totalorder %s1041_s16, %s2087_s6 }
  0xa8   : > { %p1482_p3 = scmp.lt.s32.totalorder %s1480_s19, %s1476_s7 }
  0xa9   : > { %p1478_p12 = pnand %p1477_p8, %p1678_p9 }
  0xaa   : > { %p1483_p5 = por %p1482_p3, %p1481_p1 }
  0xab   : > { %p1479_p0 = pneg %p1478_p12 }
  0xad   : > { %p1484_p6 = pnand %p1483_p5, %p1479_p0 }
  0xaf   : > { %1487 = shalt.err (!%p1484_p6)
}
  0xb0   : > { %1295 = dma.vmem_to_hbm [thread:$0]  (%p1678_p9), %s1044_s28, 16, %s1041_s16, %s987_s14  }
  0xb1   : > { %s2099_s8 = sshll.u32 %s1713_s29, 6  ;;  %s1289_s14 = sshll.u32 %s1568_s24, 10 }
  0xb2   : > { %s1962_s16 = scalar_lea.vmem [#allocation7], %s2099_s8  ;;  %s2030_s15 = scalar_lea.hbm %s2084_s3, %s1289_s14 }
  0xb3   : > { %s1001_s28 = sshll.u32 %s1962_s16, 4  ;;  %s974_s24 = scalar_lea.sflag [#allocation6], %s1713_s29  ;;  %s2024_s28 = int_to_ptr.vmem [resolvable:$true] %s1001_s28 }
  0xb4   : > { %s1488_s17 = scalar_lea.vmem %s2024_s28, 1024  ;;  %s1585_s7 = smov [#allocation7]  }
  0xb5   : > { %p1489_p7 = scmp.ne.s32.totalorder %s2024_s28, %s1488_s17  ;;  %s1492_s20 = sshll.u32 %s1585_s7, 4  ;;  %s1493_s20 = int_to_ptr.vmem [resolvable:$false] %s1492_s20 }
  0xb6   : > { %s1494_s18 = scalar_lea.vmem %s1493_s20, 2048  ;;  %p1495_p13 = scmp.lt.s32.totalorder %s2024_s28, %s1493_s20 }
  0xb7   : > { %p1490_p10 = pnand %p1489_p7, %p1678_p9  ;;  %p1496_p2 = scmp.lt.s32.totalorder %s1494_s18, %s1488_s17 }
  0xb9   : > { %p1491_p4 = pneg %p1490_p10  ;;  %p1497_p8 = por %p1496_p2, %p1495_p13 }
  0xbb   : > { %p1498_p12 = pnand %p1497_p8, %p1491_p4 }
  0xf8   : > { %v547_v61 = vpop.f32.mrf.mxu0  ;;  %v620_v62 = vpop.f32.mrf.mxu1 }
  0xfa   : > { %v549_v63 = vpop.f32.mrf.mxu0  ;;  %v622_v1 = vpop.f32.mrf.mxu1 }
  0xfb   : > { %vm805_vm11 = vcmp.gt.f32.partialorder %v549_v63, %v547_v61 }
  0xfc   : > { %v551_v2 = vpop.f32.mrf.mxu0  ;;  %v624_v3 = vpop.f32.mrf.mxu1  ;;  %v813_v17 = vsel %vm805_vm11, %v549_v63, %v547_v61  ;;  %v821_v29 = vsel %vm805_vm11, 1, %v1581_v0 }
  0xfd   : > { %vm829_vm15 = vcmp.gt.f32.partialorder %v620_v62, %v813_v17 }
  0xfe   : > { %v553_v4 = vpop.f32.mrf.mxu0  ;;  %v626_v5 = vpop.f32.mrf.mxu1  ;;  %v837_v27 = vsel %vm829_vm15, %v620_v62, %v813_v17  ;;  %v845_v37 = vsel %vm829_vm15, 2, %v821_v29 }
  0xff   : > { %vm806_vm12 = vcmp.gt.f32.partialorder %v553_v4, %v551_v2  ;;  %vm853_vm4 = vcmp.gt.f32.partialorder %v622_v1, %v837_v27 }
 0x100   : > { %v557_v6 = vpop.f32.mrf.mxu0  ;;  %v630_v7 = vpop.f32.mrf.mxu1  ;;  %v814_v20 = vsel %vm806_vm12, %v553_v4, %v551_v2  ;;  %v822_v31 = vsel %vm806_vm12, 1, %v1581_v0  ;;  %v861_v44 = vsel %vm853_vm4, %v622_v1, %v837_v27  ;;  %v869_v46 = vsel %vm853_vm4, 3, %v845_v37 }
 0x101   : > { %vm830_vm0 = vcmp.gt.f32.partialorder %v624_v3, %v814_v20 }
 0x102   : > { %v559_v8 = vpop.f32.mrf.mxu0  ;;  %v1848_v9 = vpop.f32.mrf.mxu1  ;;  %v838_v32 = vsel %vm830_vm0, %v624_v3, %v814_v20  ;;  %v846_v42 = vsel %vm830_vm0, 2, %v822_v31 }
 0x103   : > { %vm807_vm13 = vcmp.gt.f32.partialorder %v559_v8, %v557_v6  ;;  %vm854_vm5 = vcmp.gt.f32.partialorder %v626_v5, %v838_v32 }
 0x104   : > { %v561_v10 = vpop.f32.mrf.mxu0  ;;  %v634_v11 = vpop.f32.mrf.mxu1  ;;  %v815_v22 = vsel %vm807_vm13, %v559_v8, %v557_v6  ;;  %v823_v38 = vsel %vm807_vm13, 1, %v1581_v0  ;;  %v862_v50 = vsel %vm854_vm5, %v626_v5, %v838_v32  ;;  %v870_v51 = vsel %vm854_vm5, 3, %v846_v42 }
 0x105   : > { %vm831_vm2 = vcmp.gt.f32.partialorder %v630_v7, %v815_v22 }
 0x106   : > { %v563_v12 = vpop.f32.mrf.mxu0  ;;  %v1850_v13 = vpop.f32.mrf.mxu1  ;;  %v839_v35 = vsel %vm831_vm2, %v630_v7, %v815_v22  ;;  %v847_v47 = vsel %vm831_vm2, 2, %v823_v38 }
 0x107   : > { %vm808_vm14 = vcmp.gt.f32.partialorder %v563_v12, %v561_v10  ;;  %vm855_vm7 = vcmp.gt.f32.partialorder %v1848_v9, %v839_v35 }
 0x108   : > { %v1852_v14 = vpop.f32.mrf.mxu0  ;;  %v1854_v15 = vpop.f32.mrf.mxu1  ;;  %v816_v24 = vsel %vm808_vm14, %v563_v12, %v561_v10  ;;  %v824_v39 = vsel %vm808_vm14, 1, %v1581_v0  ;;  %v863_v54 = vsel %vm855_vm7, %v1848_v9, %v839_v35  ;;  %v871_v59 = vsel %vm855_vm7, 3, %v847_v47 }
 0x109   : > { %vm832_vm3 = vcmp.gt.f32.partialorder %v634_v11, %v816_v24 }
 0x10a   : > { %v1856_v16 = vpop.f32.mrf.mxu0  ;;  %v1859_v18 = vpop.f32.mrf.mxu1  ;;  %v840_v40 = vsel %vm832_vm3, %v634_v11, %v816_v24  ;;  %v848_v48 = vsel %vm832_vm3, 2, %v824_v39 }
 0x10b   : > { %vm809_vm1 = vcmp.gt.f32.partialorder %v1856_v16, %v1852_v14  ;;  %vm856_vm9 = vcmp.gt.f32.partialorder %v1850_v13, %v840_v40 }
 0x10c   : > { %v1861_v19 = vpop.f32.mrf.mxu0  ;;  %v1864_v21 = vpop.f32.mrf.mxu1  ;;  %v817_v33 = vsel %vm809_vm1, %v1856_v16, %v1852_v14  ;;  %v864_v60 = vsel %vm856_vm9, %v1850_v13, %v840_v40  ;;  %v872_v61 = vsel %vm856_vm9, 3, %v848_v48  ;;  %v825_v63 = vsel %vm809_vm1, 1, %v1581_v0 }
 0x10d   : > { %vm833_vm6 = vcmp.gt.f32.partialorder %v1854_v15, %v817_v33 }
 0x10e   : > { %v1867_v23 = vpop.f32.mrf.mxu0  ;;  %v1870_v25 = vpop.f32.mrf.mxu1  ;;  %v841_v52 = vsel %vm833_vm6, %v1854_v15, %v817_v33  ;;  %v849_v10 = vsel %vm833_vm6, 2, %v825_v63 }
 0x10f   : > { %vm810_vm8 = vcmp.gt.f32.partialorder %v1867_v23, %v1861_v19  ;;  %vm857_vm12 = vcmp.gt.f32.partialorder %v1859_v18, %v841_v52 }
 0x110   : > { %v1874_v26 = vpop.f32.mrf.mxu0  ;;  %v1877_v28 = vpop.f32.mrf.mxu1  ;;  %v1929_v55 = vsel %vm810_vm8, %v1867_v23, %v1861_v19  ;;  %v865_v11 = vsel %vm857_vm12, %v1859_v18, %v841_v52  ;;  %v873_v33 = vsel %vm857_vm12, 3, %v849_v10  ;;  %v826_v35 = vsel %vm810_vm8, 1, %v1581_v0 }
 0x111   : > { %vm834_vm13 = vcmp.gt.f32.partialorder %v1864_v21, %v1929_v55 }
 0x112   : > { %v1881_v30 = vpop.f32.mrf.mxu0  ;;  %v1891_v34 = vpop.f32.mrf.mxu1  ;;  %v842_v13 = vsel %vm834_vm13, %v1864_v21, %v1929_v55 }
 0x113   : > { %vm811_vm14 = vcmp.gt.f32.partialorder %v1881_v30, %v1874_v26  ;;  %vm858_vm9 = vcmp.gt.f32.partialorder %v1870_v25, %v842_v13 }
 0x114   : > { %v1894_v36 = vpop.f32.mrf.mxu0  ;;  %v1902_v41 = vpop.f32.mrf.mxu1  ;;  %v819_v15 = vsel %vm811_vm14, %v1881_v30, %v1874_v26  ;;  %v827_v52 = vsel %vm811_vm14, 1, %v1581_v0 }
 0x116   : > { %v1906_v43 = vpop.f32.mrf.mxu0  ;;  %v1912_v45 = vpop.f32.mrf.mxu1 }
 0x117   : > { %vm812_vm3 = vcmp.gt.f32.partialorder %v1906_v43, %v1894_v36 }
 0x118   : > { %v693_v49 = vpop.f32.mrf.mxu0  ;;  %v766_v53 = vpop.f32.mrf.mxu1  ;;  %v820_v18 = vsel %vm812_vm3, %v1906_v43, %v1894_v36 }
 0x119   : > { %vm877_vm10 = vcmp.gt.f32.partialorder %v693_v49, %v861_v44 }
 0x11a   : > { %v885_v56 = vsel %vm877_vm10, %v693_v49, %v861_v44  ;;  %v893_v57 = vsel %vm877_vm10, 4, %v869_v46  ;;  %v695_v58 = vpop.f32.mrf.mxu0  ;;  %v768_v62 = vpop.f32.mrf.mxu1  ;;  %vm835_vm10 = vcmp.gt.f32.partialorder %v1877_v28, %v819_v15  ;;  %v850_v49 = vsel %vm834_vm13, 2, %v826_v35 }
 0x11b   : > { %vm901_vm11 = vcmp.gt.f32.partialorder %v695_v58, %v885_v56  ;;  %v843_v21 = vsel %vm835_vm10, %v1877_v28, %v819_v15  ;;  %vm836_vm13 = vcmp.gt.f32.partialorder %v1902_v41, %v820_v18 }
 0x11c   : > { %v909_v1 = vsel %vm901_vm11, %v695_v58, %v885_v56  ;;  %v917_v2 = vsel %vm901_vm11, 5, %v893_v57  ;;  %v697_v3 = vpop.f32.mrf.mxu0  ;;  %v770_v4 = vpop.f32.mrf.mxu1 }
 0x11d   : > { %vm925_vm15 = vcmp.gt.f32.partialorder %v766_v53, %v909_v1  ;;  %vm878_vm0 = vcmp.gt.f32.partialorder %v697_v3, %v862_v50 }
 0x11e   : > { %v933_v5 = vsel %vm925_vm15, %v766_v53, %v909_v1  ;;  %v941_v6 = vsel %vm925_vm15, 6, %v917_v2  ;;  %v886_v7 = vsel %vm878_vm0, %v697_v3, %v862_v50  ;;  %v894_v8 = vsel %vm878_vm0, 4, %v870_v51  ;;  %v699_v9 = vpop.f32.mrf.mxu0  ;;  %v772_v12 = vpop.f32.mrf.mxu1 }
 0x11f   : > { %vm949_vm1 = vcmp.gt.f32.partialorder %v768_v62, %v933_v5  ;;  %vm902_vm2 = vcmp.gt.f32.partialorder %v699_v9, %v886_v7  ;;  %v866_v50 = vsel %vm858_vm9, %v1870_v25, %v842_v13  ;;  %v851_v62 = vsel %vm835_vm10, 2, %v827_v52 }
 0x120   : > { %v957_v14 = vsel %vm949_vm1, 7, %v941_v6  ;;  %v910_v16 = vsel %vm902_vm2, %v699_v9, %v886_v7  ;;  %v918_v17 = vsel %vm902_vm2, 5, %v894_v8  ;;  %v703_v20 = vpop.f32.mrf.mxu0  ;;  %v776_v22 = vpop.f32.mrf.mxu1  ;;  %v828_v5 = vsel %vm812_vm3, 1, %v1581_v0 }
 0x121   : > { %965 = vst [vmem:[%s1962_s16] sm:$0xff] %v957_v14  ;;  %vm926_vm4 = vcmp.gt.f32.partialorder %v770_v4, %v910_v16  ;;  %vm879_vm5 = vcmp.gt.f32.partialorder %v703_v20, %v863_v54  ;;  %v844_v25 = vsel %vm836_vm13, %v1902_v41, %v820_v18 }
 0x122   : > { %v934_v24 = vsel %vm926_vm4, %v770_v4, %v910_v16  ;;  %v942_v27 = vsel %vm926_vm4, 6, %v918_v17  ;;  %v887_v29 = vsel %vm879_vm5, %v703_v20, %v863_v54  ;;  %v895_v31 = vsel %vm879_vm5, 4, %v871_v59  ;;  %v705_v32 = vpop.f32.mrf.mxu0  ;;  %v778_v37 = vpop.f32.mrf.mxu1 }
 0x123   : > { %vm950_vm6 = vcmp.gt.f32.partialorder %v772_v12, %v934_v24  ;;  %vm903_vm7 = vcmp.gt.f32.partialorder %v705_v32, %v887_v29  ;;  %vm859_vm4 = vcmp.gt.f32.partialorder %v1891_v34, %v843_v21  ;;  %v852_v16 = vsel %vm836_vm13, 2, %v828_v5 }
 0x124   : > { %v958_v38 = vsel %vm950_vm6, 7, %v942_v27  ;;  %v911_v39 = vsel %vm903_vm7, %v705_v32, %v887_v29  ;;  %v919_v40 = vsel %vm903_vm7, 5, %v895_v31  ;;  %v707_v42 = vpop.f32.mrf.mxu0  ;;  %v780_v19 = vpop.f32.mrf.mxu1  ;;  %v875_v36 = vsel %vm859_vm4, 3, %v851_v62 }
 0x125   : > { %966 = vst [vmem:[%s1962_s16 + $0x8] sm:$0xff] %v958_v38  ;;  %vm927_vm11 = vcmp.gt.f32.partialorder %v776_v22, %v911_v39  ;;  %vm880_vm8 = vcmp.gt.f32.partialorder %v707_v42, %v864_v60 }
 0x126   : > { %v935_v23 = vsel %vm927_vm11, %v776_v22, %v911_v39  ;;  %v943_v44 = vsel %vm927_vm11, 6, %v919_v40  ;;  %v888_v46 = vsel %vm880_vm8, %v707_v42, %v864_v60  ;;  %v896_v47 = vsel %vm880_vm8, 4, %v872_v61  ;;  %v709_v48 = vpop.f32.mrf.mxu0  ;;  %v782_v51 = vpop.f32.mrf.mxu1 }
 0x127   : > { %vm951_vm12 = vcmp.gt.f32.partialorder %v778_v37, %v935_v23  ;;  %vm904_vm15 = vcmp.gt.f32.partialorder %v709_v48, %v888_v46  ;;  %v874_v61 = vsel %vm858_vm9, 3, %v850_v49  ;;  %vm860_vm9 = vcmp.gt.f32.partialorder %v1912_v45, %v844_v25 }
 0x128   : > { %v959_v53 = vsel %vm951_vm12, 7, %v943_v44  ;;  %v912_v54 = vsel %vm904_vm15, %v709_v48, %v888_v46  ;;  %v920_v56 = vsel %vm904_vm15, 5, %v896_v47  ;;  %v713_v57 = vpop.f32.mrf.mxu0  ;;  %v786_v55 = vpop.f32.mrf.mxu1  ;;  %v868_v41 = vsel %vm860_vm9, %v1912_v45, %v844_v25 }
 0x129   : > { %967 = vst [vmem:[%s1962_s16 + $0x10] sm:$0xff] %v959_v53  ;;  %vm928_vm0 = vcmp.gt.f32.partialorder %v780_v19, %v912_v54  ;;  %vm881_vm1 = vcmp.gt.f32.partialorder %v713_v57, %v865_v11  ;;  %v876_v35 = vsel %vm860_vm9, 3, %v852_v16 }
 0x12a   : > { %v936_v58 = vsel %vm928_vm0, %v780_v19, %v912_v54  ;;  %v944_v59 = vsel %vm928_vm0, 6, %v920_v56  ;;  %v889_v60 = vsel %vm881_vm1, %v713_v57, %v865_v11  ;;  %v897_v26 = vsel %vm881_vm1, 4, %v873_v33  ;;  %v715_v30 = vpop.f32.mrf.mxu0  ;;  %v788_v63 = vpop.f32.mrf.mxu1 }
 0x12b   : > { %vm952_vm14 = vcmp.gt.f32.partialorder %v782_v51, %v936_v58  ;;  %vm905_vm2 = vcmp.gt.f32.partialorder %v715_v30, %v889_v60  ;;  %v867_v11 = vsel %vm859_vm4, %v1891_v34, %v843_v21 }
 0x12c   : > { %v960_v1 = vsel %vm952_vm14, 7, %v944_v59  ;;  %v913_v2 = vsel %vm905_vm2, %v715_v30, %v889_v60  ;;  %v921_v3 = vsel %vm905_vm2, 5, %v897_v26  ;;  %v717_v4 = vpop.f32.mrf.mxu0  ;;  %v790_v28 = vpop.f32.mrf.mxu1 }
 0x12d   : > { %968 = vst [vmem:[%s1962_s16 + $0x18] sm:$0xff] %v960_v1  ;;  %vm929_vm5 = vcmp.gt.f32.partialorder %v786_v55, %v913_v2  ;;  %vm882_vm6 = vcmp.gt.f32.partialorder %v717_v4, %v866_v50 }
 0x12e   : > { %v937_v6 = vsel %vm929_vm5, %v786_v55, %v913_v2  ;;  %v945_v7 = vsel %vm929_vm5, 6, %v921_v3  ;;  %v890_v8 = vsel %vm882_vm6, %v717_v4, %v866_v50  ;;  %v898_v9 = vsel %vm882_vm6, 4, %v874_v61  ;;  %v719_v10 = vpop.f32.mrf.mxu0  ;;  %v792_v0 = vpop.f32.mrf.mxu1 }
 0x12f   : > { %vm953_vm7 = vcmp.gt.f32.partialorder %v788_v63, %v937_v6  ;;  %vm906_vm3 = vcmp.gt.f32.partialorder %v719_v10, %v890_v8 }
 0x130   : > { %v961_v43 = vsel %vm953_vm7, 7, %v945_v7  ;;  %v914_v12 = vsel %vm906_vm3, %v719_v10, %v890_v8  ;;  %v922_v13 = vsel %vm906_vm3, 5, %v898_v9  ;;  %v723_v14 = vpop.f32.mrf.mxu0  ;;  %v796_v17 = vpop.f32.mrf.mxu1 }
 0x131   : > { %969 = vst [vmem:[%s1962_s16 + $0x20] sm:$0xff] %v961_v43  ;;  %vm930_vm10 = vcmp.gt.f32.partialorder %v790_v28, %v914_v12  ;;  %vm883_vm11 = vcmp.gt.f32.partialorder %v723_v14, %v867_v11 }
 0x132   : > { %v938_v20 = vsel %vm930_vm10, %v790_v28, %v914_v12  ;;  %v946_v15 = vsel %vm930_vm10, 6, %v922_v13  ;;  %v891_v22 = vsel %vm883_vm11, %v723_v14, %v867_v11  ;;  %v899_v34 = vsel %vm883_vm11, 4, %v875_v36  ;;  %v725_v24 = vpop.f32.mrf.mxu0  ;;  %v798_v27 = vpop.f32.mrf.mxu1 }
 0x133   : > { %vm954_vm8 = vcmp.gt.f32.partialorder %v792_v0, %v938_v20  ;;  %vm907_vm12 = vcmp.gt.f32.partialorder %v725_v24, %v891_v22 }
 0x134   : > { %v962_v29 = vsel %vm954_vm8, 7, %v946_v15  ;;  %v915_v31 = vsel %vm907_vm12, %v725_v24, %v891_v22  ;;  %v923_v32 = vsel %vm907_vm12, 5, %v899_v34  ;;  %v727_v33 = vpop.f32.mrf.mxu0  ;;  %v800_v39 = vpop.f32.mrf.mxu1 }
 0x135   : > { %970 = vst [vmem:[%s1962_s16 + $0x28] sm:$0xff] %v962_v29  ;;  %vm931_vm15 = vcmp.gt.f32.partialorder %v796_v17, %v915_v31  ;;  %vm884_vm13 = vcmp.gt.f32.partialorder %v727_v33, %v868_v41 }
 0x136   : > { %v939_v37 = vsel %vm931_vm15, %v796_v17, %v915_v31  ;;  %v947_v38 = vsel %vm931_vm15, 6, %v923_v32  ;;  %v729_v40 = vpop.f32.mrf.mxu0  ;;  %v892_v42 = vsel %vm884_vm13, %v727_v33, %v868_v41  ;;  %v900_v18 = vsel %vm884_vm13, 4, %v876_v35  ;;  %v802_v44 = vpop.f32.mrf.mxu1 }
 0x137   : > { %vm955_vm0 = vcmp.gt.f32.partialorder %v798_v27, %v939_v37  ;;  %vm908_vm1 = vcmp.gt.f32.partialorder %v729_v40, %v892_v42 }
 0x138   : > { %v963_v19 = vsel %vm955_vm0, 7, %v947_v38  ;;  %v916_v45 = vsel %vm908_vm1, %v729_v40, %v892_v42  ;;  %v924_v23 = vsel %vm908_vm1, 5, %v900_v18 }
 0x139   : > { %971 = vst [vmem:[%s1962_s16 + $0x30] sm:$0xff] %v963_v19  ;;  %vm932_vm14 = vcmp.gt.f32.partialorder %v800_v39, %v916_v45 }
 0x13a   : > { %v940_v46 = vsel %vm932_vm14, %v800_v39, %v916_v45  ;;  %v948_v47 = vsel %vm932_vm14, 6, %v924_v23 }
 0x13b   : > { %vm956_vm2 = vcmp.gt.f32.partialorder %v802_v44, %v940_v46 }
 0x13c   : > { %v964_v48 = vsel %vm956_vm2, 7, %v948_v47 }
 0x13d   : > { %972 = vst [vmem:[%s1962_s16 + $0x38] sm:$0xff] %v964_v48 }
 0x13e   : > { %1501 = shalt.err (!%p1498_p12)
}
 0x13f   : > { %s1502_s19 = scalar_lea.hbm %s2030_s15, 1024  ;;  %s1506_s8 = scalar_lea.hbm %s2084_s3, 2048 }
 0x140   : > { %p1503_p0 = scmp.ne.s32.totalorder %s2030_s15, %s1502_s19  ;;  %p1507_p5 = scmp.lt.s32.totalorder %s2030_s15, %s2084_s3 }
 0x141   : > { %p1508_p6 = scmp.lt.s32.totalorder %s1506_s8, %s1502_s19 }
 0x142   : > { %p1504_p1 = pnand %p1503_p0, %p1678_p9 }
 0x143   : > { %p1509_p7 = por %p1508_p6, %p1507_p5 }
 0x144   : > { %p1505_p3 = pneg %p1504_p1 }
 0x146   : > { %p1510_p10 = pnand %p1509_p7, %p1505_p3 }
 0x148   : > { %1513 = shalt.err (!%p1510_p10)
}
 0x149   : > { %s1586_s27 = smov 128   ;;  %s1587_s13 = smov 8  }
 0x14a   : > { %1292 = dma.vmem_to_hbm [thread:$0]  (%p1678_p9), %s2024_s28, 1024, %s2030_s15, %s974_s24, %s1586_s27, %s1586_s27, %s1587_s13  }
 0x14b PF: > { %s1055_s17 = sand.u32 1, %s1556_s21   ;;  %p2100_p4 = scmp.ge.s32.totalorder %s1576_s26, 2 }
 0x14c   : > { %s1056_s7 = scalar_lea.sflag [#allocation6], %s1055_s17 }
 0x14d   : > { %p1305_p13 = pnand %p2100_p4, %p1687_p11 }
 0x14f   : > { %p1306_p2 = pneg %p1305_p13 }
 0x151   : > { %1543 = dma.done.wait (%p1306_p2), %s1056_s7, 1024  }
 0x152   : > { %1545 = vsyncadd (%p1306_p2), %s1056_s7, 4294966272  ;;  %s2101_s20 = sadd.s32 4294967294, %s1576_s26  }
 0x153   : > { %s1064_s18 = sand.u32 1, %s2101_s20  }
 0x154   : > { %s1065_s19 = scalar_lea.sflag [#allocation9], %s1064_s18 }
 0x155   : > { %1547 = dma.done.wait (%p1306_p2), %s1065_s19, 32  }
 0x156   : > { %1549 = vsyncadd (%p1306_p2), %s1065_s19, 4294967264  ;;  %s1081_s10 = scalar_lea.sflag [#allocation12], %s1055_s17 }
 0x157   : > { %1551 = dma.done.wait (%p1306_p2), %s1081_s10, 16  }
 0x158   : > { %1553 = vsyncadd (%p1306_p2), %s1081_s10, 4294967280  ;;  %s29_s26 = sadd.s32 1, %s1576_s26   ;;  %s2102_s12 = sld [smem:[#allocation17_spill]] }
 0x159   : > { %p26_p9 = scmp.ge.s32.totalorder %s29_s26, 4   ;;  %s2103_s21 = smov %s1560_s22 }
 0x15a   : > { %s2104_s22 = smov %s1564_s23  ;;  %s2105_s23 = smov %s1685_s11 }
 0x15b   : > { %s2106_s24 = smov %s1572_s25  ;;  %28 = sbr.rel (!%p26_p9) target bundleno = 10 (0xa), region = 136 }
 0x15e   : > { %s2107_s25 = smov %s2102_s12 }
 0x160   :  { %1085 = vsyncpa [#allocation5], 1 }
 0x161   :  { %1087 = vsyncpa [#allocation5 + $0x1], 1 }
 0x162   :  { %1088 = vsyncpa [#allocation6], 1 }
 0x163   :  { %1090 = vsyncpa [#allocation6 + $0x1], 1 }
 0x164   :  { %1091 = vsyncpa [#allocation9], 1 }
 0x165   :  { %1093 = vsyncpa [#allocation9 + $0x1], 1 }
 0x166   :  { %1094 = vsyncpa [#allocation12], 1 }
 0x167   :  { %1096 = vsyncpa [#allocation12 + $0x1], 1 }

</bundles_post_ra>
